<compile_context>
chip_gen: v7x
topology: tpu7x:2x2x1
jax: 0.10.0
libtpu: 0.0.40
codegen_flags: <defaults>
</compile_context>

<pallas_src>
import numpy as np

import jax
import jax.numpy as jnp
from jax.experimental import pallas as pl
from jax.experimental.pallas import tpu as pltpu

# ------------------------- "consts" (synthetic) -------------------------
LSTM_DIM = 32       # input_dim
AC_EMBED_DIM = 16   # num_embed
STATE_DIM = 64      # state_dim (only used by the pretrain=True proj)
# TODO(synk): pretrain=True branch (self.proj = Linear(state_dim, input_dim))
# is not exercised; default ActorModule() has pretrain=False, so `state`
# already has last dim == input_dim.


# ------------------------------ kernel ----------------------------------
def actor_kernel(state_ref, w_ref, b_ref, hi_ref, std_ref, out_ref):
    # state tile [TM, G*D], block-diag weight [G*D, G*N], bias/hi/mask [1, G*N].
    s = state_ref[...]                                               # f32
    # Single fused MXU matmul: embed + mean_x/y + logstd_x/y for G rows/lane-row.
    y = jnp.dot(s, w_ref[...], preferred_element_type=jnp.float32)   # [TM, G*N]
    y = y + b_ref[...]
    # std columns: exp(clip(y, -2, hi)); hi is 0.25 for logstd_x, 1.0 for logstd_y.
    y_std = jnp.exp(jnp.clip(y, -2.0, hi_ref[...]))                  # EUP exp
    out_ref[...] = jnp.where(std_ref[...] > 0.0, y_std, y).astype(out_ref.dtype)


# --------------------------- tiling helpers ------------------------------
def _choose_group(batch, group_max):
    """Largest power of two <= group_max dividing batch (lane-packing factor)."""
    g = 1
    while g * 2 <= group_max and batch % (g * 2) == 0:
        g *= 2
    return g


def _choose_tile(rows, tm_cap):
    """rows = packed rows; tm_cap = max tile rows (multiple of 8, >= 8)."""
    if rows > tm_cap:
        return tm_cap
    if rows <= 512:
        return rows  # single block; block dim == full array dim is always legal
    # Split into two roughly equal 8-aligned tiles so the "parallel" grid axis
    # spans both v7x TensorCores.
    return min(tm_cap, ((-(-rows // 2)) + 7) // 8 * 8)


# ------------------------------ wrapper ---------------------------------
def actor_forward_packed(state, params, *, tm_max=8192, group_max=8):
    """state: [B, input_dim] f32. Returns packed [B, E+4] slab
    (columns: embed[0:E], mean_x, mean_y, std_x, std_y)."""
    B, D = state.shape
    w = params["w_packed"]                     # [D, E+4]
    b = params["b_packed"]                     # [1, E+4]
    N = w.shape[1]
    E = N - 4

    # --- lane-pack G rows per packed row (free reshapes, no padding) ---
    G = _choose_group(B, group_max)
    Bg, DG, NG = B // G, D * G, N * G
    state_g = state.reshape(Bg, DG)            # row-major metadata reshape
    if G > 1:
        w_g = jnp.kron(jnp.eye(G, dtype=w.dtype), w)   # block-diagonal [DG, NG]
        b_g = jnp.tile(b, (1, G))
    else:
        w_g, b_g = w, b

    # --- per-column constants, hoisted to tiny VMEM-resident inputs ---
    col = np.arange(NG) % N
    hi_vec = jnp.asarray(np.where(col == E + 2, 0.25, 1.0)[None, :].astype(np.float32))
    std_msk = jnp.asarray((col >= E + 2)[None, :].astype(np.float32))

    # --- tile / grid ---
    tm_cap = max(8, ((tm_max // G) // 8) * 8)          # multiple of 8
    TM = _choose_tile(Bg, tm_cap)
    grid = pl.cdiv(Bg, TM)                             # ragged last block OK

    out = pl.pallas_call(
        actor_kernel,
        out_shape=jax.ShapeDtypeStruct((Bg, NG), jnp.float32),
        grid=(grid,),
        in_specs=[
            pl.BlockSpec((TM, DG), lambda i: (i, 0)),   # state tile (pipelined)
            pl.BlockSpec((DG, NG), lambda i: (0, 0)),   # block-diag weight (resident)
            pl.BlockSpec((1, NG), lambda i: (0, 0)),    # bias (resident)
            pl.BlockSpec((1, NG), lambda i: (0, 0)),    # clamp upper bounds
            pl.BlockSpec((1, NG), lambda i: (0, 0)),    # std-column mask
        ],
        out_specs=pl.BlockSpec((TM, NG), lambda i: (i, 0)),
        compiler_params=pltpu.CompilerParams(
            dimension_semantics=("parallel",),
            vmem_limit_bytes=32 * 1024 * 1024),
        cost_estimate=pl.CostEstimate(
            flops=2 * Bg * DG * NG,
            transcendentals=Bg * NG,
            bytes_accessed=4 * (Bg * DG + DG * NG + 3 * NG + Bg * NG)),
    )(state_g, w_g, b_g, hi_vec, std_msk)

    return out.reshape(B, N)                   # free reshape back to [B, E+4]


def actor_forward(state, params, *, tm_max=8192, group_max=8):
    """Module-compatible API: returns (ac_embed, (ac_pos_mean, ac_pos_std)).
    NOTE: prefer consuming actor_forward_packed's slab inside a larger jit so
    the three slices fuse into the consumer instead of materializing copies."""
    out = actor_forward_packed(state, params, tm_max=tm_max, group_max=group_max)
    E = params["w_packed"].shape[1] - 4
    return out[:, :E], (out[:, E:E + 2], out[:, E + 2:E + 4])


# --------------------------- parameter init ------------------------------
def init_params(key, input_dim=LSTM_DIM, num_embed=AC_EMBED_DIM):
    # nn.Linear default init: U(-1/sqrt(fan_in), 1/sqrt(fan_in)); weights [in, out].
    # Packed columns: [ac_embed(0:E) | mean_x | mean_y | logstd_x | logstd_y].
    outs = [num_embed, 1, 1, 1, 1]
    bound = 1.0 / float(np.sqrt(input_dim))
    keys = jax.random.split(key, 2 * len(outs))
    ws, bs = [], []
    for i, n_out in enumerate(outs):
        ws.append(jax.random.uniform(keys[2 * i], (input_dim, n_out),
                                     jnp.float32, -bound, bound))
        bs.append(jax.random.uniform(keys[2 * i + 1], (1, n_out),
                                     jnp.float32, -bound, bound))
    return dict(w_packed=jnp.concatenate(ws, axis=1),
                b_packed=jnp.concatenate(bs, axis=1))


# -------------------------- pure-JAX reference ---------------------------
def actor_forward_ref(state, params, num_embed=AC_EMBED_DIM):
    w, b = params["w_packed"], params["b_packed"]
    y = state @ w + b
    embed = y[:, :num_embed]
    mean = y[:, num_embed:num_embed + 2]
    std = jnp.concatenate(
        [jnp.exp(jnp.clip(y[:, num_embed + 2:num_embed + 3], -2.0, 0.25)),
         jnp.exp(jnp.clip(y[:, num_embed + 3:num_embed + 4], -2.0, 1.0))], axis=-1)
    return embed, (mean, std)


def _check(got, want, name):
    e, (m, s) = got
    re, (rm, rs) = want
    assert jnp.allclose(e, re, atol=1e-4, rtol=1e-4), f"{name}: embed mismatch"
    assert jnp.allclose(m, rm, atol=1e-4, rtol=1e-4), f"{name}: mean mismatch"
    assert jnp.allclose(s, rs, atol=1e-4, rtol=1e-4), f"{name}: std mismatch"


if __name__ == "__main__":
    key = jax.random.PRNGKey(0)
    k_param, k1, k2, k3 = jax.random.split(key, 4)
    params = init_params(k_param)

    # Small serving-style batch (G=2 lane packing, single full-array block).
    B = 2
    state = jax.random.normal(k1, (B, LSTM_DIM), jnp.float32)
    out = actor_forward(state, params)
    jax.block_until_ready(out)
    _check(out, actor_forward_ref(state, params), "B=2")

    # Ragged batch not divisible by 8 (G=4, single block, TM == full dim, no pad copy).
    B2 = 300
    state2 = jax.random.normal(k2, (B2, LSTM_DIM), jnp.float32)
    out2 = actor_forward(state2, params)
    jax.block_until_ready(out2)
    _check(out2, actor_forward_ref(state2, params), "B=300")

    # Larger batch with a small tile cap -> grid > 1, G=8 lane-dense input,
    # ragged last block handled by Pallas (no padding).
    B3 = 1000
    state3 = jax.random.normal(k3, (B3, LSTM_DIM), jnp.float32)
    out3 = actor_forward(state3, params, tm_max=256)
    jax.block_until_ready(out3)
    _check(out3, actor_forward_ref(state3, params), "B=1000")

    print("KERNEL_OK")
</pallas_src>

<mosaic_0001>
module attributes {stable_mosaic.version = 11 : i64} {
  func.func @actor_kernel(%arg0: i32, %arg1: memref<1x64xf32, #tpu.memory_space<vmem>>, %arg2: memref<64x40xf32, #tpu.memory_space<vmem>>, %arg3: memref<1x40xf32, #tpu.memory_space<vmem>>, %arg4: memref<1x40xf32, #tpu.memory_space<vmem>>, %arg5: memref<1x40xf32, #tpu.memory_space<vmem>>, %arg6: memref<1x40xf32, #tpu.memory_space<vmem>>) attributes {dimension_semantics = [#tpu.dimension_semantics<parallel>], iteration_bounds = array<i64: 1>, scalar_prefetch = 0 : i64, scratch_operands = 0 : i64, tpu.core_type = #tpu.core_type<tc>, window_params = [{transform_indices = @transform_0, window_bounds = array<i64: 1, 64>}, {pipeline_mode = #tpu.pipeline_mode<synchronous>, transform_indices = @transform_1, window_bounds = array<i64: 64, 40>}, {pipeline_mode = #tpu.pipeline_mode<synchronous>, transform_indices = @transform_2, window_bounds = array<i64: 1, 40>}, {pipeline_mode = #tpu.pipeline_mode<synchronous>, transform_indices = @transform_3, window_bounds = array<i64: 1, 40>}, {pipeline_mode = #tpu.pipeline_mode<synchronous>, transform_indices = @transform_4, window_bounds = array<i64: 1, 40>}, {transform_indices = @transform_5, window_bounds = array<i64: 1, 40>}]} {
    %c0 = arith.constant 0 : index
    %c0_0 = arith.constant 0 : index
    %0 = vector.load %arg1[%c0, %c0_0] : memref<1x64xf32, #tpu.memory_space<vmem>>, vector<1x64xf32>
    %c0_1 = arith.constant 0 : index
    %c0_2 = arith.constant 0 : index
    %1 = vector.load %arg2[%c0_1, %c0_2] : memref<64x40xf32, #tpu.memory_space<vmem>>, vector<64x40xf32>
    %cst = arith.constant dense<0.000000e+00> : vector<1x40xf32>
    %2 = tpu.matmul %0, %1, %cst {dimension_numbers = #tpu.dot_dimension_numbers<[1], [0], [0], [1], [0, 0, 1, 1], [], []>} : vector<1x64xf32>, vector<64x40xf32>, vector<1x40xf32> -> vector<1x40xf32>
    %c0_3 = arith.constant 0 : index
    %c0_4 = arith.constant 0 : index
    %3 = vector.load %arg3[%c0_3, %c0_4] : memref<1x40xf32, #tpu.memory_space<vmem>>, vector<1x40xf32>
    %4 = arith.addf %2, %3 : vector<1x40xf32>
    %c0_5 = arith.constant 0 : index
    %c0_6 = arith.constant 0 : index
    %5 = vector.load %arg4[%c0_5, %c0_6] : memref<1x40xf32, #tpu.memory_space<vmem>>, vector<1x40xf32>
    %cst_7 = arith.constant -2.000000e+00 : f32
    %6 = vector.broadcast %cst_7 : f32 to vector<1x40xf32>
    %7 = arith.maximumf %6, %4 : vector<1x40xf32>
    %8 = arith.minimumf %5, %7 : vector<1x40xf32>
    %9 = math.exp %8 : vector<1x40xf32>
    %c0_8 = arith.constant 0 : index
    %c0_9 = arith.constant 0 : index
    %10 = vector.load %arg5[%c0_8, %c0_9] : memref<1x40xf32, #tpu.memory_space<vmem>>, vector<1x40xf32>
    %cst_10 = arith.constant 0.000000e+00 : f32
    %11 = vector.broadcast %cst_10 : f32 to vector<1x40xf32>
    %12 = arith.cmpf ogt, %10, %11 : vector<1x40xf32>
    %13 = arith.select %12, %9, %4 : vector<1x40xi1>, vector<1x40xf32>
    %c0_11 = arith.constant 0 : index
    %c0_12 = arith.constant 0 : index
    %14 = vector.load %arg6[%c0_11, %c0_12] : memref<1x40xf32, #tpu.memory_space<vmem>>, vector<1x40xf32>
    tpu.vector_store %arg6[%c0_11, %c0_12], %13 {strides = array<i32>} : memref<1x40xf32, #tpu.memory_space<vmem>>, vector<1x40xf32>,
    return
  }
  func.func @transform_0(%arg0: i32) -> (i32, i32) {
    %c0_i32 = arith.constant 0 : i32
    %c0_i32_0 = arith.constant 0 : i32
    return %arg0, %c0_i32 : i32, i32
  }
  func.func @transform_1(%arg0: i32) -> (i32, i32) {
    %c0_i32 = arith.constant 0 : i32
    %c0_i32_0 = arith.constant 0 : i32
    %c0_i32_1 = arith.constant 0 : i32
    return %c0_i32, %c0_i32_0 : i32, i32
  }
  func.func @transform_2(%arg0: i32) -> (i32, i32) {
    %c0_i32 = arith.constant 0 : i32
    %c0_i32_0 = arith.constant 0 : i32
    %c0_i32_1 = arith.constant 0 : i32
    return %c0_i32, %c0_i32_0 : i32, i32
  }
  func.func @transform_3(%arg0: i32) -> (i32, i32) {
    %c0_i32 = arith.constant 0 : i32
    %c0_i32_0 = arith.constant 0 : i32
    %c0_i32_1 = arith.constant 0 : i32
    return %c0_i32, %c0_i32_0 : i32, i32
  }
  func.func @transform_4(%arg0: i32) -> (i32, i32) {
    %c0_i32 = arith.constant 0 : i32
    %c0_i32_0 = arith.constant 0 : i32
    %c0_i32_1 = arith.constant 0 : i32
    return %c0_i32, %c0_i32_0 : i32, i32
  }
  func.func @transform_5(%arg0: i32) -> (i32, i32) {
    %c0_i32 = arith.constant 0 : i32
    %c0_i32_0 = arith.constant 0 : i32
    return %arg0, %c0_i32 : i32, i32
  }
}

</mosaic_0001>

<bundles_post_ra>
// kernel: tpu_custom_call.1
= control target key start
LH: loop header
LB: loop body
LE: loop exit
PB: predicated region body
PF: predicated region fallthrough
CT: control target
= control target key end

     0   :  { %v200_v3 = vmov 0.0|0.0   ;;  %vm201_vm0 = vmmov 0   ;;  %v202_v6 = vmov 0.0   ;;  %s282_s0 = inlined_call_operand.vmem [shape: f32[1,64], index: 0, kind: input, shape index: {}]   ;;  %s283_s1 = inlined_call_operand.vmem [shape: f32[64,40], index: 1, kind: input, shape index: {}]   ;;  %s284_s2 = inlined_call_operand.vmem [shape: f32[1,40], index: 2, kind: input, shape index: {}]   ;;  %s285_s3 = inlined_call_operand.vmem [shape: f32[1,40], index: 3, kind: input, shape index: {}]   ;;  %s286_s4 = inlined_call_operand.vmem [shape: f32[1,40], index: 4, kind: input, shape index: {}]   ;;  %s287_s5 = inlined_call_operand.hbm [shape: f32[1,40], index: 5, kind: output, shape index: {}]  }
   0x1   :  { %v22_v0 = vld [vmem:[%s283_s1] sm:$0xff]  ;;  %v23_v1 = vld [vmem:[%s283_s1 + $0x8] sm:$0xff]  ;;  %v24_v2 = vld [vmem:[%s283_s1 + $0x10] sm:$0xff]  ;;  %158 = vmatprep.subr.bf16.mxu0 %v200_v3  ;;  %155 = vmatprep.mubr.msk.f32.mxu0 %vm201_vm0, %v202_v6 }
   0x2   :  { %v159_v4 = vpack.c.bf16 %v23_v1, %v22_v0  ;;  %v25_v5 = vld [vmem:[%s283_s1 + $0x18] sm:$0xff] }
   0x3   :  { %v162_v7 = vpack.c.bf16 %v25_v5, %v24_v2 }
   0x4   :  { %160 = vmatpush3.bf16.msra.mxu0 %v159_v4 }
   0x5   :  { %10 = vsyncpa [#allocation3], 0  ;;  %161 = vmatprep.subr.bf16.mxu0 %v200_v3  ;;  %v26_v8 = vld [vmem:[%s283_s1 + $0x20] sm:$0xff]  ;;  %v27_v9 = vld [vmem:[%s283_s1 + $0x28] sm:$0xff]  ;;  %vm31_vm1 = vcmask 523264   ;;  %vm113_vm3 = vcmask 319488  }
   0x6   :  { %v165_v10 = vpack.c.bf16 %v27_v9, %v26_v8  ;;  %v28_v11 = vld [vmem:[%s283_s1 + $0x30] sm:$0xff]  ;;  %v29_v12 = vld [vmem:[%s283_s1 + $0x38] sm:$0xff]  ;;  %v21_v14 = vld [vmem:[%s282_s0] sm:$0x1]  ;;  %s203_s0 = smov [#allocation2]  }
   0x7   :  { %v168_v13 = vpack.c.bf16 %v29_v12, %v28_v11  ;;  %v30_v15 = vld [vmem:[%s284_s2] sm:$0x1]  ;;  %s121_s16 = sshll.u32 %s203_s0, 4  ;;  %s122_s16 = int_to_ptr.vmem [resolvable:$true] %s121_s16 }
   0x8   :  { %163 = vmatpush3.bf16.msra.mxu0 %v162_v7  ;;  %v105_v19 = vld [vmem:[%s285_s3] sm:$0x1]  ;;  %s176_s2 = scalar_lea.vmem %s122_s16, 16  ;;  %s180_s17 = scalar_lea.vmem %s122_s16, 32 }
   0x9   :  { %164 = vmatprep.subr.bf16.mxu0 %v200_v3  ;;  %v110_v23 = vld [vmem:[%s286_s4] sm:$0x1]  ;;  %p177_p0 = scmp.ne.s32.totalorder %s122_s16, %s176_s2  ;;  %p181_p1 = scmp.lt.s32.totalorder %s122_s16, %s122_s16 }
   0xa   :  { %vm111_vm2 = vcmp.gt.f32.partialorder %v110_v23, 0.0  ;;  %p182_p2 = scmp.lt.s32.totalorder %s180_s17, %s176_s2 }
   0xc   :  { %166 = vmatpush3.bf16.msra.mxu0 %v165_v10  ;;  %p183_p3 = por %p182_p2, %p181_p1 }
   0xd   :  { %167 = vmatprep.subr.bf16.mxu0 %v200_v3 }
   0xe   :  { %p184_p4 = pnand %p183_p3, %p177_p0 }
  0x10   :  { %169 = vmatpush3.bf16.msra.mxu0 %v168_v13 }
  0x13   :  { %156 = vmatmul.mubr.msk.f32.vlgmr.msra.gmra.mrb[0].mxu0 %vm31_vm1, %v21_v14 }
  0xe6   :  { %v101_v16 = vpop.f32.mrb[0].mxu0 }
  0xe7   :  { %v102_v17 = vadd.f32 %v101_v16, %v30_v15  ;;  %v157_v18 = vpop.f32.mrb[1].mxu0 }
  0xe9   :  { %v106_v20 = vmax.f32 %v102_v17, -2.0 }
  0xeb   :  { %v107_v21 = vmin.f32 %v105_v19, %v106_v20 }
  0xed   :  { %v108_v22 = vmul.f32 1.442695, %v107_v21 }
  0xef   :  { %174 = vpow2.f32 %v108_v22 }
  0xf9   :  { %v175_v24 = vpop.eup %174 }
  0xfa   :  { %v112_v25 = vsel %vm111_vm2, %v175_v24, %v102_v17 }
  0xfb   :  { %114 = vst.msk [vmem:[#allocation2] sm:$0x1] %vm113_vm3, %v112_v25 }
  0xfc   :  { %187 = shalt.err (!%p184_p4)
}
  0xfd   :  { %s188_s4 = scalar_lea.hbm %s287_s5, 16 }
  0xfe   :  { %p189_p5 = scmp.ne.s32.totalorder %s287_s5, %s188_s4  ;;  %p192_p6 = scmp.lt.u32.totalorder %s188_s4, %s287_s5 }
 0x100   :  { %p194_p7 = pnand %p192_p6, %p189_p5 }
 0x102   :  { %197 = shalt.err (!%p194_p7)
}
 0x103   :  { %124 = dma.vmem_to_hbm [thread:$0]  %s122_s16, 16, %s287_s5, [#allocation3]  }
 0x104   :  { %198 = dma.done.wait [#allocation3], 16  }
 0x105   :  { %199 = vsyncadd [#allocation3], 4294967280 }
 0x106   :  { %128 = vsyncpa [#allocation3], 1 }

</bundles_post_ra>
